<compile_context>
chip_gen: v7x
topology: tpu7x:2x2x1
jax: 0.10.0
libtpu: 0.0.40
codegen_flags: <defaults>
</compile_context>

<pallas_src>
import math

import jax
import jax.numpy as jnp
from jax.experimental import pallas as pl
from jax.experimental.pallas import tpu as pltpu


def eca_kernel_size(channel, b=1, gamma=2):
    k = int(abs((math.log(channel, 2) + b) / gamma))
    k = k if k % 2 else k + 1
    return k


def _make_eca_kernel(k, pad, inv_hw):
    """Fused pool -> k-tap channel conv -> sigmoid -> scale kernel body."""

    def kernel(w_ref, x_ref, o_ref):
        # w_ref: (k,) f32 in SMEM          (Conv1d taps)
        # x_ref: (1, Cp, HWp) in VMEM      (one batch element, lane-dense HW)
        # o_ref: (1, Cp, HWp) in VMEM
        x = x_ref[0]                                   # (Cp, HWp), input dtype
        C = x.shape[0]

        # Global average pool over the spatial (lane) axis in f32.
        # Padded lanes are zero so the sum is exact; divide by the TRUE H*W.
        y = jnp.sum(x, axis=-1, keepdims=True, dtype=jnp.float32) * inv_hw  # (Cp, 1)

        # k-tap zero-padded 1D conv along the channel (sublane) axis, written
        # as masked rolls of the pooled vector.  k / pad are compile-time
        # constants so the loop fully unrolls; rolls go to the XLU slot.
        ch = jax.lax.broadcasted_iota(jnp.int32, (C, 1), 0)        # channel idx
        conv = jnp.zeros((C, 1), jnp.float32)
        for j in range(k):
            off = j - pad                       # conv[i] += w[j] * y[i + off]
            w_j = w_ref[j]                      # scalar f32 from SMEM
            if off == 0:
                conv = conv + w_j * y
            else:
                shifted = pltpu.roll(y, shift=(-off) % C, axis=0)  # y[(i+off) % C]
                valid = (ch + off >= 0) & (ch + off < C)           # zero padding
                conv = conv + w_j * jnp.where(valid, shifted, 0.0)

        # Sigmoid on (Cp, 1) is tiny (EUP); scale-multiply stays in input dtype
        # so bf16 inputs never materialize a full f32 slab.
        scale = jax.nn.sigmoid(conv).astype(x.dtype)               # (Cp, 1)
        o_ref[0] = x * scale                                       # broadcast HW

    return kernel


def eca_block_forward(x, conv_weight):
    """x: (B, C, H, W) NCHW (f32 or bf16).  conv_weight: (k,) f32 Conv1d taps."""
    B, C, H, W = x.shape
    HW = H * W
    k = int(conv_weight.shape[0])
    pad = (k - 1) // 2

    # Lane-dense / sublane-aligned padding (no-op when already aligned).
    LANE, SUB = 128, 8
    HWp = ((HW + LANE - 1) // LANE) * LANE
    Cp = ((C + SUB - 1) // SUB) * SUB

    x_flat = x.reshape(B, C, HW)
    needs_pad = (HWp != HW) or (Cp != C)
    if needs_pad:
        # Zero padding keeps both the pooled sums and the conv edges exact.
        x_flat = jnp.pad(x_flat, ((0, 0), (0, Cp - C), (0, HWp - HW)))

    w = conv_weight.astype(jnp.float32)

    itemsize = x.dtype.itemsize
    slab_bytes = Cp * HWp * itemsize
    # in + out, each double-buffered by the pipeline, plus headroom.
    vmem_limit = int(4 * slab_bytes + 8 * 2**20)

    cost = pl.CostEstimate(
        flops=int(B * (2 * Cp * HWp + 2 * k * Cp)),        # pool + scale + conv
        transcendentals=int(B * Cp),                       # sigmoid
        bytes_accessed=int(2 * B * Cp * HWp * itemsize + k * 4),
    )

    kernel = _make_eca_kernel(k, pad, 1.0 / float(HW))

    out_flat = pl.pallas_call(
        kernel,
        out_shape=jax.ShapeDtypeStruct((B, Cp, HWp), x.dtype),
        grid=(B,),
        in_specs=[
            pl.BlockSpec(memory_space=pltpu.MemorySpace.SMEM),   # (k,) conv taps
            pl.BlockSpec((1, Cp, HWp), lambda b: (b, 0, 0)),     # x slab
        ],
        out_specs=pl.BlockSpec((1, Cp, HWp), lambda b: (b, 0, 0)),
        compiler_params=pltpu.CompilerParams(
            dimension_semantics=("parallel",),
            vmem_limit_bytes=vmem_limit,
        ),
        cost_estimate=cost,
    )(w, x_flat)

    if needs_pad:
        out_flat = out_flat[:, :C, :HW]
    return out_flat.reshape(B, C, H, W)


def _reference(x, conv_weight):
    """Pure-JAX reference mirroring the PyTorch forward."""
    B, C, H, W = x.shape
    k = conv_weight.shape[0]
    pad = (k - 1) // 2
    y = jnp.mean(x.astype(jnp.float32), axis=(2, 3))        # (B, C)
    y_pad = jnp.pad(y, ((0, 0), (pad, pad)))
    conv = jnp.zeros_like(y)
    for j in range(k):
        conv = conv + conv_weight[j] * y_pad[:, j:j + C]
    scale = jax.nn.sigmoid(conv)[:, :, None, None]
    return (x.astype(jnp.float32) * scale).astype(x.dtype)


if __name__ == "__main__":
    B, C, H, W = 2, 16, 16, 16          # C=16 -> ECA kernel_size = 3, HW=256 (lane-dense)
    k = eca_kernel_size(C)

    key = jax.random.PRNGKey(0)
    kx, kw = jax.random.split(key)
    x = jax.random.normal(kx, (B, C, H, W), dtype=jnp.float32)
    # Deterministic Conv1d(1, 1, k, bias=False) weight, shape (1,1,k) -> (k,).
    bound = 1.0 / math.sqrt(k)
    conv_weight = jax.random.uniform(
        kw, (k,), dtype=jnp.float32, minval=-bound, maxval=bound
    )

    fwd = jax.jit(eca_block_forward)
    out = jax.block_until_ready(fwd(x, conv_weight))

    ref = _reference(x, conv_weight)
    assert out.shape == (B, C, H, W)
    assert jnp.allclose(out, ref, atol=1e-5, rtol=1e-5)

    print("KERNEL_OK")
</pallas_src>

<mosaic_0001>
module attributes {stable_mosaic.version = 11 : i64} {
  func.func @kernel(%arg0: i32, %arg1: memref<3xf32, #tpu.memory_space<smem>>, %arg2: memref<1x16x256xf32, #tpu.memory_space<vmem>>, %arg3: memref<1x16x256xf32, #tpu.memory_space<vmem>>) attributes {dimension_semantics = [#tpu.dimension_semantics<parallel>], iteration_bounds = array<i64: 2>, scalar_prefetch = 0 : i64, scratch_operands = 0 : i64, tpu.core_type = #tpu.core_type<tc>, window_params = [{transform_indices = @transform_0, window_bounds = array<i64: 3>}, {transform_indices = @transform_1, window_bounds = array<i64: 1, 16, 256>}, {transform_indices = @transform_2, window_bounds = array<i64: 1, 16, 256>}]} {
    %c0 = arith.constant 0 : index
    %c0_0 = arith.constant 0 : index
    %c0_1 = arith.constant 0 : index
    %0 = vector.load %arg2[%c0, %c0_0, %c0_1] : memref<1x16x256xf32, #tpu.memory_space<vmem>>, vector<1x16x256xf32>
    %1 = vector.shape_cast %0 : vector<1x16x256xf32> to vector<16x256xf32>
    %cst = arith.constant dense<0.000000e+00> : vector<16xf32>
    %2 = vector.multi_reduction <add>, %1, %cst [1] : vector<16x256xf32> to vector<16xf32>
    %3 = vector.shape_cast %2 : vector<16xf32> to vector<16x1xf32>
    %cst_2 = arith.constant 3.906250e-03 : f32
    %4 = vector.broadcast %cst_2 : f32 to vector<16x1xf32>
    %5 = arith.mulf %3, %4 : vector<16x1xf32>
    %6 = tpu.iota {dimensions = array<i32: 0>} : vector<16x1xi32>
    %cst_3 = arith.constant 0.000000e+00 : f32
    %7 = vector.broadcast %cst_3 : f32 to vector<16x1xf32>
    %c0_4 = arith.constant 0 : index
    %8 = memref.load %arg1[%c0_4] : memref<3xf32, #tpu.memory_space<smem>>
    %c1_i32 = arith.constant 1 : i32
    %9 = tpu.dynamic_rotate %5 by %c1_i32 dim 0 : vector<16x1xf32>, i32 -> vector<16x1xf32>
    %c-1_i32 = arith.constant -1 : i32
    %10 = vector.broadcast %c-1_i32 : i32 to vector<16x1xi32>
    %11 = arith.addi %6, %10 : vector<16x1xi32>
    %c0_i32 = arith.constant 0 : i32
    %12 = vector.broadcast %c0_i32 : i32 to vector<16x1xi32>
    %13 = arith.cmpi sge, %11, %12 : vector<16x1xi32>
    %c-1_i32_5 = arith.constant -1 : i32
    %14 = vector.broadcast %c-1_i32_5 : i32 to vector<16x1xi32>
    %15 = arith.addi %6, %14 : vector<16x1xi32>
    %c16_i32 = arith.constant 16 : i32
    %16 = vector.broadcast %c16_i32 : i32 to vector<16x1xi32>
    %17 = arith.cmpi slt, %15, %16 : vector<16x1xi32>
    %18 = arith.andi %13, %17 : vector<16x1xi1>
    %cst_6 = arith.constant 0.000000e+00 : f32
    %19 = vector.broadcast %cst_6 : f32 to vector<16x1xf32>
    %20 = arith.select %18, %9, %19 : vector<16x1xi1>, vector<16x1xf32>
    %21 = vector.broadcast %8 : f32 to vector<16x1xf32>
    %22 = arith.mulf %21, %20 : vector<16x1xf32>
    %23 = arith.addf %7, %22 : vector<16x1xf32>
    %c1 = arith.constant 1 : index
    %24 = memref.load %arg1[%c1] : memref<3xf32, #tpu.memory_space<smem>>
    %25 = vector.broadcast %24 : f32 to vector<16x1xf32>
    %26 = arith.mulf %25, %5 : vector<16x1xf32>
    %27 = arith.addf %23, %26 : vector<16x1xf32>
    %c2 = arith.constant 2 : index
    %28 = memref.load %arg1[%c2] : memref<3xf32, #tpu.memory_space<smem>>
    %c15_i32 = arith.constant 15 : i32
    %29 = tpu.dynamic_rotate %5 by %c15_i32 dim 0 : vector<16x1xf32>, i32 -> vector<16x1xf32>
    %c1_i32_7 = arith.constant 1 : i32
    %30 = vector.broadcast %c1_i32_7 : i32 to vector<16x1xi32>
    %31 = arith.addi %6, %30 : vector<16x1xi32>
    %c0_i32_8 = arith.constant 0 : i32
    %32 = vector.broadcast %c0_i32_8 : i32 to vector<16x1xi32>
    %33 = arith.cmpi sge, %31, %32 : vector<16x1xi32>
    %c1_i32_9 = arith.constant 1 : i32
    %34 = vector.broadcast %c1_i32_9 : i32 to vector<16x1xi32>
    %35 = arith.addi %6, %34 : vector<16x1xi32>
    %c16_i32_10 = arith.constant 16 : i32
    %36 = vector.broadcast %c16_i32_10 : i32 to vector<16x1xi32>
    %37 = arith.cmpi slt, %35, %36 : vector<16x1xi32>
    %38 = arith.andi %33, %37 : vector<16x1xi1>
    %cst_11 = arith.constant 0.000000e+00 : f32
    %39 = vector.broadcast %cst_11 : f32 to vector<16x1xf32>
    %40 = arith.select %38, %29, %39 : vector<16x1xi1>, vector<16x1xf32>
    %41 = vector.broadcast %28 : f32 to vector<16x1xf32>
    %42 = arith.mulf %41, %40 : vector<16x1xf32>
    %43 = arith.addf %27, %42 : vector<16x1xf32>
    %44 = arith.negf %43 : vector<16x1xf32>
    %45 = math.exp %44 : vector<16x1xf32>
    %cst_12 = arith.constant 1.000000e+00 : f32
    %46 = vector.broadcast %cst_12 : f32 to vector<16x1xf32>
    %47 = arith.addf %46, %45 : vector<16x1xf32>
    %48 = arith.divf %46, %47 : vector<16x1xf32>
    %49 = vector.broadcast %48 : vector<16x1xf32> to vector<16x256xf32>
    %50 = arith.mulf %1, %49 : vector<16x256xf32>
    %c0_13 = arith.constant 0 : index
    %c0_14 = arith.constant 0 : index
    %c0_15 = arith.constant 0 : index
    %51 = vector.load %arg3[%c0_13, %c0_14, %c0_15] : memref<1x16x256xf32, #tpu.memory_space<vmem>>, vector<1x16x256xf32>
    %52 = vector.shape_cast %51 : vector<1x16x256xf32> to vector<16x256xf32>
    %53 = vector.shape_cast %50 : vector<16x256xf32> to vector<1x16x256xf32>
    tpu.vector_store %arg3[%c0_13, %c0_14, %c0_15], %53 {strides = array<i32>} : memref<1x16x256xf32, #tpu.memory_space<vmem>>, vector<1x16x256xf32>,
    return
  }
  func.func @transform_0(%arg0: i32) -> i32 {
    %c0_i32 = arith.constant 0 : i32
    %c0_i32_0 = arith.constant 0 : i32
    return %c0_i32 : i32
  }
  func.func @transform_1(%arg0: i32) -> (i32, i32, i32) {
    %c0_i32 = arith.constant 0 : i32
    %c0_i32_0 = arith.constant 0 : i32
    %c0_i32_1 = arith.constant 0 : i32
    return %arg0, %c0_i32, %c0_i32_0 : i32, i32, i32
  }
  func.func @transform_2(%arg0: i32) -> (i32, i32, i32) {
    %c0_i32 = arith.constant 0 : i32
    %c0_i32_0 = arith.constant 0 : i32
    %c0_i32_1 = arith.constant 0 : i32
    return %arg0, %c0_i32, %c0_i32_0 : i32, i32, i32
  }
}

</mosaic_0001>

<bundles_post_ra>
// kernel: eca_block_forward.1
= control target key start
LH: loop header
LB: loop body
LE: loop exit
PB: predicated region body
PF: predicated region fallthrough
CT: control target
= control target key end

     0   :  { %7 = vsyncpa [#allocation3], 0  ;;  %s411_s9 = smov 0   ;;  %s465_s0 = inlined_call_operand.vmem [shape: f32[3], index: 0, kind: input, shape index: {}]   ;;  %s466_s1 = inlined_call_operand.vmem [shape: f32[2,16,256], index: 1, kind: input, shape index: {}]   ;;  %s467_s2 = inlined_call_operand.vmem [shape: f32[2,16,256], index: 2, kind: output, shape index: {}]  }
   0x1 LB: > { %s318_s10 = sadd.s32 4294967295, %s392_s9   ;;  %p320_p0 = scmp.ge.s32.totalorder %s392_s9, 1  ;;  %s392_s9 = sphi %s411_s9, %s13_s9  }
   0x2   : > { %p91_p1 = scmp.lt.s32.totalorder %s392_s9, 3  ;;  %s104_s13 = sshll.u32 %s465_s0, 4  ;;  %s105_s13 = int_to_ptr.vmem [resolvable:$true] %s104_s13 }
   0x3   : > { %p345_p3 = scmp.eq.s32.totalorder %s318_s10, 0  ;;  %s367_s15 = scalar_lea.vmem %s105_s13, 16 }
   0x4   : > { %p422_p2 = pnand %p320_p0, %p91_p1  ;;  %p368_p6 = scmp.ne.s32.totalorder %s105_s13, %s367_s15 }
   0x5   : > { %p375_p10 = scmp.lt.s32.totalorder %s105_s13, %s105_s13  ;;  %p376_p11 = scmp.lt.s32.totalorder %s367_s15, %s367_s15 }
   0x6   : > { %p341_p4 = pneg %p422_p2 }
   0x7   : > { %p377_p12 = por %p376_p11, %p375_p10 }
   0x8   : > { %p342_p5 = pnand %p345_p3, %p341_p4 }
   0xa   : > { %p369_p7 = pneg %p342_p5 }
   0xc   : > { %p370_p8 = pnand %p369_p7, %p368_p6 }
   0xe   : > { %p371_p9 = pneg %p370_p8 }
  0x10   : > { %p378_p13 = pnand %p377_p12, %p371_p9 }
  0x12   : > { %381 = shalt.err (!%p378_p13)
}
  0x13   : > { %s394_s16 = smov [#allocation2]   ;;  %125 = sbr.rel (%p422_p2) target bundleno = 356 (0x164), region = 28 }
  0x14   : > { %344 = dma.vmem_to_smem (!%p342_p5), %s105_s13, 16, %s394_s16, [#allocation3]  }
  0x1a   : > { %387 = dma.done.wait (%p345_p3), [#allocation3], 16  }
  0x1b   : > { %389 = vsyncadd (%p345_p3), [#allocation3], 4294967280 }
  0x1c   : > { %131 = sfence }
  0x1d   : > { %p148_p0 = scmp.lt.s32.totalorder %s318_s10, 1  ;;  %v395_v6 = vmov 0   ;;  %v170_v7 = vlaneseq  ;;  %s173_s21 = sld [smem:[#allocation2]] }
  0x1e   : > { %357 = vset.pattern.permute.xlu1 %v395_v6  ;;  %358 = vset.pattern.permute.xlu0 %v395_v6  ;;  %s329_s22 = sld [smem:[#allocation2 + $0x1]]  ;;  %s330_s23 = sld [smem:[#allocation2 + $0x2]] }
  0x1f   : > { %s470_s10 = smov (!%p148_p0, %s318_s10), 1  ;;  %v171_v8 = vshrl.u32 %v170_v7, 7 }
  0x20   : > { %s335_s17 = sshll.u32 %s470_s10, 5 }
  0x21   : > { %s152_s20 = scalar_lea.vmem %s466_s1, %s335_s17  ;;  %v172_v9 = vadd.s32 8, %v171_v8  ;;  %v179_v11 = vadd.s32 4294967295, %v171_v8  ;;  %vm176_vm0 = vcmp.lt.s32.totalorder %v171_v8, 1  ;;  %vm203_vm2 = vcmp.lt.s32.totalorder %v171_v8, 7  ;;  %s157_s26 = scalar_lea.vmem %s467_s2, %s335_s17 }
  0x22   : > { %v441_v0 = vld [vmem:[%s152_s20] sm:$0xff]  ;;  %v443_v1 = vld [vmem:[%s152_s20 + $0x8] sm:$0xff]  ;;  %v445_v2 = vld [vmem:[%s152_s20 + $0x10] sm:$0xff] }
  0x23   : > { %v162_v3 = vadd.f32 %v443_v1, %v441_v0  ;;  %v449_v4 = vld [vmem:[%s152_s20 + $0x18] sm:$0xff]  ;;  %v207_v12 = vadd.s32 1, %v172_v9  ;;  %vm181_vm1 = vcmp.ge.s32.totalorder %v179_v11, 0  ;;  %v189_v16 = vstv %s173_s21 }
  0x24   : > { %v165_v5 = vadd.f32 %v449_v4, %v445_v2  ;;  %v195_v21 = vstv %s329_s22  ;;  %v216_v22 = vstv %s330_s23 }
  0x25   : > { %163 = vadd.xlane.f32.xlu0 %v162_v3  ;;  %vm211_vm3 = vcmp.lt.s32.totalorder %v207_v12, 16 }
  0x29   : > { %166 = vadd.xlane.f32.xlu0 %v165_v5 }
  0xb2   : > { %v164_v10 = vpop.xlane.xlu0 %163 }
  0xb3   : > { %v168_v13 = vmul.f32 0.00390625, %v164_v10 }
  0xb5   : > { %v174_v17 = vrot.slane %v168_v13, 7  ;;  %v201_v18 = vrot.slane %v168_v13, 1  ;;  %v196_v31 = vmul.f32 %v195_v21, %v168_v13 }
  0xb6   : > { %v167_v14 = vpop.xlane.xlu0 %166 }
  0xb7   : > { %v169_v15 = vmul.f32 0.00390625, %v167_v14 }
  0xb9   : > { %v175_v19 = vrot.slane %v169_v15, 7  ;;  %v202_v20 = vrot.slane %v169_v15, 1  ;;  %v197_v25 = vmul.f32 %v195_v21, %v169_v15 }
  0xbb   : > { %v177_v23 = vsel %vm176_vm0, %v174_v17, %v175_v19  ;;  %v178_v24 = vsel %vm176_vm0, %v175_v19, %v174_v17  ;;  %v205_v26 = vsel %vm203_vm2, %v202_v20, %v201_v18  ;;  %v204_v29 = vsel %vm203_vm2, %v201_v18, %v202_v20 }
  0xbc   : > { %v187_v27 = vsel %vm181_vm1, %v178_v24, 0.0  ;;  %v191_v28 = vmul.f32 %v189_v16, %v177_v23  ;;  %v215_v30 = vsel %vm211_vm3, %v205_v26, 0.0  ;;  %v217_v36 = vmul.f32 %v216_v22, %v204_v29 }
  0xbd   : > { %v190_v32 = vmul.f32 %v189_v16, %v187_v27  ;;  %v218_v33 = vmul.f32 %v216_v22, %v215_v30 }
  0xbe   : > { %v199_v34 = vadd.f32 %v197_v25, %v191_v28 }
  0xbf   : > { %v198_v35 = vadd.f32 %v196_v31, %v190_v32 }
  0xc0   : > { %v220_v37 = vadd.f32 %v218_v33, %v199_v34 }
  0xc1   : > { %v219_v38 = vadd.f32 %v217_v36, %v198_v35 }
  0xc2   : > { %v332_v39 = vmul.f32 -1.442695, %v220_v37 }
  0xc3   : > { %v331_v40 = vmul.f32 -1.442695, %v219_v38 }
  0xc4   : > { %359 = vpow2.f32 %v332_v39 }
  0xc5   : > { %361 = vpow2.f32 %v331_v40 }
  0xce   : > { %v360_v41 = vpop.eup %359 }
  0xcf   : > { %v362_v42 = vpop.eup %361  ;;  %v228_v44 = vadd.f32 1.0, %v360_v41 }
  0xd0   : > { %v227_v43 = vadd.f32 1.0, %v362_v42 }
  0xd2   : > { %363 = vrcp.f32 %v227_v43 }
  0xd3   : > { %365 = vrcp.f32 %v228_v44 }
  0xdc   : > { %v364_v45 = vpop.eup %363 }
  0xdd   : > { %235 = vperm.xlu1 %357, %v364_v45   ;;  %v366_v46 = vpop.eup %365 }
  0xe1   : > { %240 = vperm.xlu1 %357, %v366_v46  }
 0x15c   : > { %v236_v47 = vpop.permute.xlu1 %235 }
 0x15d   : > { %v243_v48 = vmul.f32 %v236_v47, %v441_v0  ;;  %v244_v49 = vmul.f32 %v236_v47, %v443_v1 }
 0x15f   : > { %247 = vst [vmem:[%s157_s26] sm:$0xff] %v243_v48  ;;  %248 = vst [vmem:[%s157_s26 + $0x8] sm:$0xff] %v244_v49 }
 0x160   : > { %v241_v50 = vpop.permute.xlu1 %240 }
 0x161   : > { %v245_v51 = vmul.f32 %v241_v50, %v445_v2  ;;  %v246_v52 = vmul.f32 %v241_v50, %v449_v4 }
 0x163   : > { %249 = vst [vmem:[%s157_s26 + $0x10] sm:$0xff] %v245_v51  ;;  %250 = vst [vmem:[%s157_s26 + $0x18] sm:$0xff] %v246_v52 }
 0x164 PF: > { %s13_s9 = sadd.s32 1, %s392_s9  }
 0x165   : > { %p10_p1 = scmp.ge.s32.totalorder %s13_s9, 4  }
 0x167   :  { %12 = sbr.rel (!%p10_p1) target bundleno = 1 (0x1), region = 63 }
 0x16e   :  { %272 = vsyncpa [#allocation3], 1 }
 0x16f   :  { %274 = vsyncpa [#allocation3 + $0x1], 1 }

</bundles_post_ra>
